<compile_context>
chip_gen: v5e
topology: v5e:2x2
jax: 0.10.0
libtpu: 0.0.40
codegen_flags: <defaults>
</compile_context>

<pallas_src>
from functools import partial

import jax
import jax.numpy as jnp
from jax.experimental import pallas as pl
from jax.experimental.pallas import tpu as pltpu

QUANT_GRIDS = {
    "e1m2": (-1.75, -1.5, -1.25, -1.0, -0.75, -0.5, -0.25, 0.0,
             0.25, 0.5, 0.75, 1.0, 1.25, 1.5, 1.75),
    "e2m1": (-6.0, -4.0, -3.0, -2.0, -1.5, -1.0, -0.5, 0.0,
             0.5, 1.0, 1.5, 2.0, 3.0, 4.0, 6.0),
    "e3m0": (-16.0, -8.0, -4.0, -2.0, -1.0, -0.5, -0.25, 0.0,
             0.25, 0.5, 1.0, 2.0, 4.0, 8.0, 16.0),
}


def _grid_constants(fmt):
    """Trace-time constants: non-negative grid levels, bin midpoints, abs-max."""
    grid_vals = QUANT_GRIDS[fmt]
    # All supported grids are symmetric around 0, so quantizing |x| against the
    # non-negative half and restoring the sign is exact.
    pos_levels = tuple(v for v in grid_vals if v >= 0.0)          # ascending
    midpoints = tuple((pos_levels[i] + pos_levels[i + 1]) * 0.5
                      for i in range(len(pos_levels) - 1))        # exact floats
    grid_absmax = max(abs(v) for v in grid_vals)
    return pos_levels, midpoints, grid_absmax


# ----------------------------------------------------------------------------
# Shared in-kernel body: clamp + per-row scale + midpoint-chain quantize.
# ----------------------------------------------------------------------------
def _clamp_and_quantize(x, clip_v, *, pos_levels, midpoints, inv_grid_absmax):
    x = jnp.clip(x, -clip_v, clip_v)
    row_max = jnp.max(jnp.abs(x), axis=-1, keepdims=True)          # (rows, 1)
    scale = row_max * inv_grid_absmax                              # (rows, 1)
    # One reciprocal per *row* (not per element); approx=False keeps bin
    # boundaries bit-faithful to the reference's divide.
    inv_scale = pl.reciprocal(scale, approx=False)
    a = jnp.abs(x) * inv_scale                                     # |x / scale|

    # Monotone midpoint-threshold chain: 7 (cmp + select) pairs on the VPU.
    # Strict '>' -> exact midpoint ties keep the lower level (argmin semantics).
    q = jnp.zeros_like(a)                                          # level 0 == 0.0
    for mid, lvl in zip(midpoints, pos_levels[1:]):
        q = jnp.where(a > mid, lvl, q)

    return jnp.where(x < 0.0, -q, q) * scale


# ----------------------------------------------------------------------------
# Kernel A: fused single-pass (whole flattened tensor resident in VMEM).
# ----------------------------------------------------------------------------
def _fused_kernel(strength_ref, x_ref, o_ref, *, pos_levels, midpoints,
                  inv_grid_absmax):
    x = x_ref[...].astype(jnp.float32)
    clip_v = strength_ref[0, 0] * jnp.max(jnp.abs(x))
    out = _clamp_and_quantize(x, clip_v, pos_levels=pos_levels,
                              midpoints=midpoints,
                              inv_grid_absmax=inv_grid_absmax)
    o_ref[...] = out.astype(o_ref.dtype)


# ----------------------------------------------------------------------------
# Kernel B1: per-block partial |x| max (independent blocks, "parallel" axis).
# Each block writes its scalar max broadcast into its own (8, 128) output tile.
# ----------------------------------------------------------------------------
def _absmax_partial_kernel(x_ref, o_ref):
    m = jnp.max(jnp.abs(x_ref[...].astype(jnp.float32)))
    o_ref[...] = jnp.zeros(o_ref.shape, jnp.float32) + m


# ----------------------------------------------------------------------------
# Kernel B2: clamp + per-group quantize for one large row tile.
# ----------------------------------------------------------------------------
def _quant_kernel(clip_ref, x_ref, o_ref, *, pos_levels, midpoints,
                  inv_grid_absmax):
    x = x_ref[...].astype(jnp.float32)
    out = _clamp_and_quantize(x, clip_ref[0, 0], pos_levels=pos_levels,
                              midpoints=midpoints,
                              inv_grid_absmax=inv_grid_absmax)
    o_ref[...] = out.astype(o_ref.dtype)


# ----------------------------------------------------------------------------
# Wrapper
# ----------------------------------------------------------------------------
def fp_quantize(x, clipping_strength, *, group_size=128, format="e2m1",
                max_fused_bytes=2 * 1024 * 1024, block_bytes=1024 * 1024):
    pos_levels, midpoints, grid_absmax = _grid_constants(format)
    inv_grid_absmax = 1.0 / grid_absmax

    orig_shape = x.shape
    orig_dtype = x.dtype
    xg = x.reshape(-1, group_size)            # row-major, matches torch reshape
    n_rows = xg.shape[0]
    strength = jnp.asarray(clipping_strength, jnp.float32).reshape(1, 1)

    quant_consts = dict(pos_levels=pos_levels, midpoints=midpoints,
                        inv_grid_absmax=inv_grid_absmax)

    # ---- fused single-pass path --------------------------------------------
    # Conservative threshold: in + out buffers plus a few full-size f32
    # temporaries must fit the scoped VMEM limit on every chip (v7x included).
    if n_rows * group_size * 4 <= max_fused_bytes:
        out = pl.pallas_call(
            partial(_fused_kernel, **quant_consts),
            out_shape=jax.ShapeDtypeStruct(xg.shape, orig_dtype),
            grid=(1,),
            in_specs=[
                pl.BlockSpec(memory_space=pltpu.MemorySpace.SMEM),   # strength
                pl.BlockSpec(xg.shape, lambda i: (0, 0)),
            ],
            out_specs=pl.BlockSpec(xg.shape, lambda i: (0, 0)),
        )(strength, xg)
        return out.reshape(orig_shape)

    # ---- two-pass path (large tensors) --------------------------------------
    # Row tile: largest multiple of 8 within the byte budget.  Prefer one that
    # divides n_rows; otherwise zero-pad the last block (padding never affects
    # the abs-max, and padded rows are sliced away at the end).
    row_bytes = group_size * xg.dtype.itemsize
    budget_rows = max(8, (min(n_rows, block_bytes // row_bytes) // 8) * 8)
    block_rows = None
    for cand in range(budget_rows, max(8, budget_rows // 2) - 1, -8):
        if n_rows % cand == 0:
            block_rows = cand
            break
    if block_rows is None:
        block_rows = budget_rows
        pad_rows = (-n_rows) % block_rows
        if pad_rows:
            xg = jnp.pad(xg, ((0, pad_rows), (0, 0)))
    n_blocks = xg.shape[0] // block_rows

    # Pass 1: per-block partial |x| maxima (parallel; both v7x TCs can help).
    partial_max = pl.pallas_call(
        _absmax_partial_kernel,
        out_shape=jax.ShapeDtypeStruct((n_blocks * 8, 128), jnp.float32),
        grid=(n_blocks,),
        in_specs=[pl.BlockSpec((block_rows, group_size), lambda i: (i, 0))],
        out_specs=pl.BlockSpec((8, 128), lambda i: (i, 0)),
        compiler_params=pltpu.CompilerParams(
            dimension_semantics=("parallel",)),
    )(xg)
    clip_value = (strength[0, 0] * jnp.max(partial_max)).reshape(1, 1)

    # Pass 2: clamp + per-group quantize.
    out = pl.pallas_call(
        partial(_quant_kernel, **quant_consts),
        out_shape=jax.ShapeDtypeStruct(xg.shape, orig_dtype),
        grid=(n_blocks,),
        in_specs=[
            pl.BlockSpec(memory_space=pltpu.MemorySpace.SMEM),       # clip scalar
            pl.BlockSpec((block_rows, group_size), lambda i: (i, 0)),
        ],
        out_specs=pl.BlockSpec((block_rows, group_size), lambda i: (i, 0)),
        compiler_params=pltpu.CompilerParams(
            dimension_semantics=("parallel",)),
    )(clip_value, xg)

    if xg.shape[0] != n_rows:
        out = out[:n_rows]
    return out.reshape(orig_shape)


# ----------------------------------------------------------------------------
# Pure-JAX reference (mirrors the PyTorch forward exactly)
# ----------------------------------------------------------------------------
def fp_quantize_ref(x, clipping_strength, *, group_size=128, format="e2m1"):
    grid = jnp.array(QUANT_GRIDS[format], jnp.float32)
    clip = clipping_strength * jnp.max(jnp.abs(x))
    xc = jnp.clip(x, -clip, clip)
    xg = xc.reshape(-1, group_size)
    scale = jnp.max(jnp.abs(xg), axis=-1, keepdims=True) / jnp.max(jnp.abs(grid))
    xs = xg / scale
    idx = jnp.argmin(jnp.abs(xs[..., None] - grid), axis=-1)
    q = grid[idx]
    return (q * scale).reshape(x.shape)


if __name__ == "__main__":
    key = jax.random.PRNGKey(0)
    k1, k2, k3 = jax.random.split(key, 3)
    # Deterministic parameter init, as in FPQuantizer.__init__.
    clipping_strength = jnp.array(1.0, dtype=jnp.float32)

    # Test 1: module-sized NCHW input (2*4*16*16 = 16 groups of 128) -> fused path.
    x1 = jax.random.normal(k1, (2, 4, 16, 16), dtype=jnp.float32)
    out1 = jax.block_until_ready(
        fp_quantize(x1, clipping_strength, group_size=128, format="e2m1"))
    ref1 = fp_quantize_ref(x1, clipping_strength, group_size=128, format="e2m1")
    assert out1.shape == x1.shape and out1.dtype == x1.dtype
    assert jnp.allclose(out1, ref1, atol=1e-5, rtol=1e-5), "fused path mismatch"

    # Test 2: exercise the tiled two-pass path (multi-block, no padding).
    x2 = jax.random.normal(k2, (4, 8, 32, 32), dtype=jnp.float32)   # 256 groups
    out2 = jax.block_until_ready(
        fp_quantize(x2, clipping_strength, group_size=128, format="e1m2",
                    max_fused_bytes=0, block_bytes=32 * 1024))
    ref2 = fp_quantize_ref(x2, clipping_strength, group_size=128, format="e1m2")
    assert jnp.allclose(out2, ref2, atol=1e-5, rtol=1e-5), "tiled path mismatch"

    # Test 3: tiled path with a zero-padded remainder block (15 groups, tile of 8).
    x3 = jax.random.normal(k3, (3, 5, 8, 16), dtype=jnp.float32)    # 1920 = 15 groups
    out3 = jax.block_until_ready(
        fp_quantize(x3, clipping_strength, group_size=128, format="e3m0",
                    max_fused_bytes=0, block_bytes=32 * 1024))
    ref3 = fp_quantize_ref(x3, clipping_strength, group_size=128, format="e3m0")
    assert jnp.allclose(out3, ref3, atol=1e-5, rtol=1e-5), "padded path mismatch"

    # TODO(synk): the straight-through `.detach()` trick only changes gradients;
    # a custom_vjp would be needed for training parity, forward values are exact.
    print("KERNEL_OK")
</pallas_src>

<mosaic_0001>
module attributes {stable_mosaic.version = 11 : i64} {
  func.func @_fused_kernel(%arg0: i32, %arg1: memref<1x1xf32, #tpu.memory_space<smem>>, %arg2: memref<16x128xf32, #tpu.memory_space<vmem>>, %arg3: memref<16x128xf32, #tpu.memory_space<vmem>>) attributes {dimension_semantics = [#tpu.dimension_semantics<arbitrary>], iteration_bounds = array<i64: 1>, scalar_prefetch = 0 : i64, scratch_operands = 0 : i64, tpu.core_type = #tpu.core_type<tc>, window_params = [{transform_indices = @transform_0, window_bounds = array<i64: 1, 1>}, {pipeline_mode = #tpu.pipeline_mode<synchronous>, transform_indices = @transform_1, window_bounds = array<i64: 16, 128>}, {pipeline_mode = #tpu.pipeline_mode<synchronous>, transform_indices = @transform_2, window_bounds = array<i64: 16, 128>}]} {
    %c0 = arith.constant 0 : index
    %c0_0 = arith.constant 0 : index
    %0 = vector.load %arg2[%c0, %c0_0] : memref<16x128xf32, #tpu.memory_space<vmem>>, vector<16x128xf32>
    %c0_1 = arith.constant 0 : index
    %c0_2 = arith.constant 0 : index
    %1 = memref.load %arg1[%c0_1, %c0_2] : memref<1x1xf32, #tpu.memory_space<smem>>
    %2 = math.absf %0 : vector<16x128xf32>
    %3 = vector.shape_cast %2 : vector<16x128xf32> to vector<1x16x128xf32>
    %cst = arith.constant dense<0xFF800000> : vector<1xf32>
    %4 = vector.multi_reduction <maximumf>, %3, %cst [1, 2] : vector<1x16x128xf32> to vector<1xf32>
    %5 = vector.shape_cast %4 : vector<1xf32> to vector<1x1x1xf32>
    %6 = vector.extract %5[0, 0, 0] : f32 from vector<1x1x1xf32>
    %7 = arith.mulf %1, %6 : f32
    %cst_3 = arith.constant 0.000000e+00 : f32
    %8 = arith.subf %cst_3, %7 : f32
    %9 = vector.broadcast %8 : f32 to vector<16x128xf32>
    %10 = arith.maximumf %9, %0 : vector<16x128xf32>
    %11 = vector.broadcast %7 : f32 to vector<16x128xf32>
    %12 = arith.minimumf %11, %10 : vector<16x128xf32>
    %13 = math.absf %12 : vector<16x128xf32>
    %cst_4 = arith.constant dense<0xFF800000> : vector<16xf32>
    %14 = vector.multi_reduction <maximumf>, %13, %cst_4 [1] : vector<16x128xf32> to vector<16xf32>
    %15 = vector.shape_cast %14 : vector<16xf32> to vector<16x1xf32>
    %cst_5 = arith.constant 0.166666672 : f32
    %16 = vector.broadcast %cst_5 : f32 to vector<16x1xf32>
    %17 = arith.mulf %15, %16 : vector<16x1xf32>
    %18 = tpu.reciprocal %17 : vector<16x1xf32> -> vector<16x1xf32>
    %19 = math.absf %12 : vector<16x128xf32>
    %20 = vector.broadcast %18 : vector<16x1xf32> to vector<16x128xf32>
    %21 = arith.mulf %19, %20 : vector<16x128xf32>
    %cst_6 = arith.constant 0.000000e+00 : f32
    %22 = vector.broadcast %cst_6 : f32 to vector<16x128xf32>
    %cst_7 = arith.constant 2.500000e-01 : f32
    %23 = vector.broadcast %cst_7 : f32 to vector<16x128xf32>
    %24 = arith.cmpf ogt, %21, %23 : vector<16x128xf32>
    %cst_8 = arith.constant 5.000000e-01 : f32
    %25 = vector.broadcast %cst_8 : f32 to vector<16x128xf32>
    %26 = arith.select %24, %25, %22 : vector<16x128xi1>, vector<16x128xf32>
    %cst_9 = arith.constant 7.500000e-01 : f32
    %27 = vector.broadcast %cst_9 : f32 to vector<16x128xf32>
    %28 = arith.cmpf ogt, %21, %27 : vector<16x128xf32>
    %cst_10 = arith.constant 1.000000e+00 : f32
    %29 = vector.broadcast %cst_10 : f32 to vector<16x128xf32>
    %30 = arith.select %28, %29, %26 : vector<16x128xi1>, vector<16x128xf32>
    %cst_11 = arith.constant 1.250000e+00 : f32
    %31 = vector.broadcast %cst_11 : f32 to vector<16x128xf32>
    %32 = arith.cmpf ogt, %21, %31 : vector<16x128xf32>
    %cst_12 = arith.constant 1.500000e+00 : f32
    %33 = vector.broadcast %cst_12 : f32 to vector<16x128xf32>
    %34 = arith.select %32, %33, %30 : vector<16x128xi1>, vector<16x128xf32>
    %cst_13 = arith.constant 1.750000e+00 : f32
    %35 = vector.broadcast %cst_13 : f32 to vector<16x128xf32>
    %36 = arith.cmpf ogt, %21, %35 : vector<16x128xf32>
    %cst_14 = arith.constant 2.000000e+00 : f32
    %37 = vector.broadcast %cst_14 : f32 to vector<16x128xf32>
    %38 = arith.select %36, %37, %34 : vector<16x128xi1>, vector<16x128xf32>
    %cst_15 = arith.constant 2.500000e+00 : f32
    %39 = vector.broadcast %cst_15 : f32 to vector<16x128xf32>
    %40 = arith.cmpf ogt, %21, %39 : vector<16x128xf32>
    %cst_16 = arith.constant 3.000000e+00 : f32
    %41 = vector.broadcast %cst_16 : f32 to vector<16x128xf32>
    %42 = arith.select %40, %41, %38 : vector<16x128xi1>, vector<16x128xf32>
    %cst_17 = arith.constant 3.500000e+00 : f32
    %43 = vector.broadcast %cst_17 : f32 to vector<16x128xf32>
    %44 = arith.cmpf ogt, %21, %43 : vector<16x128xf32>
    %cst_18 = arith.constant 4.000000e+00 : f32
    %45 = vector.broadcast %cst_18 : f32 to vector<16x128xf32>
    %46 = arith.select %44, %45, %42 : vector<16x128xi1>, vector<16x128xf32>
    %cst_19 = arith.constant 5.000000e+00 : f32
    %47 = vector.broadcast %cst_19 : f32 to vector<16x128xf32>
    %48 = arith.cmpf ogt, %21, %47 : vector<16x128xf32>
    %cst_20 = arith.constant 6.000000e+00 : f32
    %49 = vector.broadcast %cst_20 : f32 to vector<16x128xf32>
    %50 = arith.select %48, %49, %46 : vector<16x128xi1>, vector<16x128xf32>
    %cst_21 = arith.constant 0.000000e+00 : f32
    %51 = vector.broadcast %cst_21 : f32 to vector<16x128xf32>
    %52 = arith.cmpf olt, %12, %51 : vector<16x128xf32>
    %cst_22 = arith.constant 0.000000e+00 : f32
    %53 = vector.broadcast %cst_22 : f32 to vector<16x128xf32>
    %54 = arith.subf %53, %50 : vector<16x128xf32>
    %55 = arith.select %52, %54, %50 : vector<16x128xi1>, vector<16x128xf32>
    %56 = vector.broadcast %17 : vector<16x1xf32> to vector<16x128xf32>
    %57 = arith.mulf %55, %56 : vector<16x128xf32>
    %c0_23 = arith.constant 0 : index
    %c0_24 = arith.constant 0 : index
    %58 = vector.load %arg3[%c0_23, %c0_24] : memref<16x128xf32, #tpu.memory_space<vmem>>, vector<16x128xf32>
    tpu.vector_store %arg3[%c0_23, %c0_24], %57 {strides = array<i32>} : memref<16x128xf32, #tpu.memory_space<vmem>>, vector<16x128xf32>,
    return
  }
  func.func @transform_0(%arg0: i32) -> (i32, i32) {
    %c0_i32 = arith.constant 0 : i32
    %c0_i32_0 = arith.constant 0 : i32
    %c0_i32_1 = arith.constant 0 : i32
    return %c0_i32, %c0_i32_0 : i32, i32
  }
  func.func @transform_1(%arg0: i32) -> (i32, i32) {
    %c0_i32 = arith.constant 0 : i32
    %c0_i32_0 = arith.constant 0 : i32
    %c0_i32_1 = arith.constant 0 : i32
    return %c0_i32, %c0_i32_0 : i32, i32
  }
  func.func @transform_2(%arg0: i32) -> (i32, i32) {
    %c0_i32 = arith.constant 0 : i32
    %c0_i32_0 = arith.constant 0 : i32
    %c0_i32_1 = arith.constant 0 : i32
    return %c0_i32, %c0_i32_0 : i32, i32
  }
}

</mosaic_0001>

<bundles_post_ra>
// kernel: tpu_custom_call.1
= control target key start
LH: loop header
LB: loop body
LE: loop exit
PB: predicated region body
PF: predicated region fallthrough
CT: control target
= control target key end

     0   :  { %8 = vsyncpa [#allocation4], 0  ;;  %s269_s0 = inlined_call_operand.<no memory space> [shape: f32[1,1], index: 0, kind: input, shape index: {}]   ;;  %s270_s1 = inlined_call_operand.hbm [shape: f32[16,128], index: 1, kind: input, shape index: {}]   ;;  %s271_s2 = inlined_call_operand.hbm [shape: f32[16,128], index: 2, kind: output, shape index: {}]  }
   0x1   :  { %9 = vsyncpa [#allocation5], 0  ;;  %s16_s11 = sshll.u32 %s270_s1, 4  ;;  %s210_s12 = smov [#allocation3]   ;;  %s17_s11 = int_to_ptr.hbm [resolvable:$true] %s16_s11 }
   0x2   :  { %s18_s13 = sshll.u32 %s210_s12, 4  ;;  %s211_s14 = smov 128   ;;  %s19_s13 = int_to_ptr.vmem [resolvable:$true] %s18_s13 }
   0x3   :  { %s212_s15 = smov 8  }
   0x4   :  { %24 = dma.hbm_to_vmem [thread:$0]  %s17_s11, 256, %s19_s13, [#allocation4], %s211_s14, %s211_s14, %s212_s15  }
   0x5   :  { %206 = dma.done.wait [#allocation4], 256  }
   0x6   :  { %207 = vsyncadd [#allocation4], 4294967040  ;;  %v29_v0 = vld [vmem:[#allocation3] sm:$0xff]  ;;  %v30_v1 = vld [vmem:[#allocation3 + $0x8] sm:$0xff]  ;;  %v213_v46 = vmov 0.0   ;;  %s134_s23 = sshll.u32 %s271_s2, 4  ;;  %s135_s23 = int_to_ptr.hbm [resolvable:$true] %s134_s23 }
   0x7   :  { %v32_v2 = vand.u32 2147483647, %v29_v0  ;;  %v33_v3 = vand.u32 2147483647, %v30_v1 }
   0x9   :  { %v34_v4 = vmax.f32 %v32_v2, %v33_v3 }
   0xb   :  { %35 = vmax.xlane.f32.xlu0 %v34_v4 }
  0x7e   :  { %v36_v5 = vpop.xlane.xlu0 %35 }
  0x7f   :  { %v37_v6 = vrot.slane %v36_v5, 4 }
  0x81   :  { %v38_v7 = vmax.f32 %v36_v5, %v37_v6 }
  0x83   :  { %v39_v8 = vrot.slane %v38_v7, 2 }
  0x85   :  { %v40_v9 = vmax.f32 %v38_v7, %v39_v8 }
  0x87   :  { %v41_v10 = vrot.slane %v40_v9, 1 }
  0x89   :  { %v42_v11 = vmax.f32 %v40_v9, %v41_v10 }
  0x8b   :  { %147 = vpush %v42_v11 }
  0xbc   :  { %s148_s1 = spop %147 }
  0xbd   :  { %s44_s18 = smul.f32 %s148_s1, %s269_s0  ;;  %s214_s0 = smov [#allocation6]  }
  0xbe   :  { %s132_s20 = sshll.u32 %s214_s0, 4  ;;  %s133_s20 = int_to_ptr.vmem [resolvable:$true] %s132_s20 }
  0xbf   :  { %s45_s19 = ssub.f32 0.0, %s44_s18  ;;  %v49_v15 = vstv %s44_s18 }
  0xc1   :  { %v46_v12 = vstv %s45_s19 }
  0xc2   :  { %v47_v13 = vmax.f32 %v46_v12, %v29_v0  ;;  %v48_v14 = vmax.f32 %v46_v12, %v30_v1 }
  0xc4   :  { %v239_v16 = vmin.f32 %v49_v15, %v47_v13  ;;  %v241_v17 = vmin.f32 %v49_v15, %v48_v14 }
  0xc6   :  { %v53_v18 = vand.u32 2147483647, %v241_v17  ;;  %v52_v19 = vand.u32 2147483647, %v239_v16 }
  0xc8   :  { %56 = vmax.xlane.f32.xlu1 %v53_v18  ;;  %54 = vmax.xlane.f32.xlu0 %v52_v19 }
 0x13b   :  { %v57_v20 = vpop.xlane.xlu1 %56  ;;  %v55_v21 = vpop.xlane.xlu0 %54 }
 0x13c   :  { %v245_v22 = vmul.f32 0.16666667, %v57_v20  ;;  %v247_v23 = vmul.f32 0.16666667, %v55_v21 }
 0x13e   :  { %154 = vrcp.f32 %v245_v22  ;;  %v85_v29 = vand.u32 2147483648, %v245_v22  ;;  %v83_v32 = vand.u32 2147483647, %v245_v22  ;;  %v71_v33 = vand.u32 2147483648, %v247_v23 }
 0x13f   :  { %156 = vrcp.f32 %v247_v23  ;;  %v69_v35 = vand.u32 2147483647, %v247_v23  ;;  %vm79_vm2 = vweird.f32 %v245_v22  ;;  %vm65_vm4 = vweird.f32 %v247_v23 }
 0x140   :  { %v86_v37 = vor.u32 1.1754944e-38, %v85_v29  ;;  %vm84_vm5 = vcmp.eq.f32.partialorder %v83_v32, 8.507059e+37  ;;  %v72_v40 = vor.u32 1.1754944e-38, %v71_v33 }
 0x141   :  { %vm70_vm7 = vcmp.eq.f32.partialorder %v69_v35, 8.507059e+37 }
 0x144   :  { %v155_v24 = vpop.eup %154 }
 0x145   :  { %v157_v25 = vpop.eup %156  ;;  %v75_v26 = vmul.f32 %v155_v24, %v245_v22  ;;  %vm80_vm0 = vweird.f32 %v155_v24 }
 0x146   :  { %v61_v27 = vmul.f32 %v157_v25, %v247_v23  ;;  %vm66_vm1 = vweird.f32 %v157_v25  ;;  %vm81_vm3 = vmor %vm79_vm2, %vm80_vm0 }
 0x147   :  { %v76_v28 = vsub.f32 1.0, %v75_v26  ;;  %vm67_vm6 = vmor %vm65_vm4, %vm66_vm1 }
 0x148   :  { %v62_v30 = vsub.f32 1.0, %v61_v27 }
 0x149   :  { %v77_v31 = vmul.f32 %v155_v24, %v76_v28 }
 0x14a   :  { %v63_v34 = vmul.f32 %v157_v25, %v62_v30 }
 0x14b   :  { %v78_v36 = vadd.f32 %v155_v24, %v77_v31 }
 0x14c   :  { %v64_v38 = vadd.f32 %v157_v25, %v63_v34 }
 0x14d   :  { %v82_v39 = vsel %vm81_vm3, %v155_v24, %v78_v36 }
 0x14e   :  { %v87_v41 = vsel %vm84_vm5, %v86_v37, %v82_v39  ;;  %v68_v42 = vsel %vm67_vm6, %v157_v25, %v64_v38  ;;  %vm119_vm6 = vcmp.lt.f32.partialorder %v241_v17, 0.0 }
 0x14f   :  { %v89_v43 = vmul.f32 %v87_v41, %v53_v18  ;;  %v73_v44 = vsel %vm70_vm7, %v72_v40, %v68_v42  ;;  %vm118_vm7 = vcmp.lt.f32.partialorder %v239_v16, 0.0 }
 0x150   :  { %v88_v45 = vmul.f32 %v73_v44, %v52_v19 }
 0x151   :  { %vm91_vm8 = vcmp.gt.f32.partialorder %v89_v43, 0.25  ;;  %vm95_vm9 = vcmp.gt.f32.partialorder %v89_v43, 0.75  ;;  %vm99_vm12 = vcmp.gt.f32.partialorder %v89_v43, 1.25  ;;  %vm103_vm14 = vcmp.gt.f32.partialorder %v89_v43, 1.75 }
 0x152   :  { %vm90_vm10 = vcmp.gt.f32.partialorder %v88_v45, 0.25  ;;  %v93_v47 = vsel %vm91_vm8, 0.5, %v213_v46  ;;  %vm94_vm11 = vcmp.gt.f32.partialorder %v88_v45, 0.75  ;;  %vm98_vm13 = vcmp.gt.f32.partialorder %v88_v45, 1.25 }
 0x153   :  { %v92_v48 = vsel %vm90_vm10, 0.5, %v213_v46  ;;  %v97_v49 = vsel %vm95_vm9, 1.0, %v93_v47  ;;  %vm102_vm15 = vcmp.gt.f32.partialorder %v88_v45, 1.75  ;;  %vm107_vm0 = vcmp.gt.f32.partialorder %v89_v43, 2.5 }
 0x154   :  { %v96_v50 = vsel %vm94_vm11, 1.0, %v92_v48  ;;  %v101_v51 = vsel %vm99_vm12, 1.5, %v97_v49  ;;  %vm106_vm1 = vcmp.gt.f32.partialorder %v88_v45, 2.5  ;;  %vm111_vm2 = vcmp.gt.f32.partialorder %v89_v43, 3.5 }
 0x155   :  { %v100_v52 = vsel %vm98_vm13, 1.5, %v96_v50  ;;  %v105_v53 = vsel %vm103_vm14, 2.0, %v101_v51  ;;  %vm110_vm3 = vcmp.gt.f32.partialorder %v88_v45, 3.5  ;;  %vm115_vm4 = vcmp.gt.f32.partialorder %v89_v43, 5.0 }
 0x156   :  { %v104_v54 = vsel %vm102_vm15, 2.0, %v100_v52  ;;  %v109_v55 = vsel %vm107_vm0, 3.0, %v105_v53  ;;  %vm114_vm5 = vcmp.gt.f32.partialorder %v88_v45, 5.0 }
 0x157   :  { %v108_v56 = vsel %vm106_vm1, 3.0, %v104_v54  ;;  %v113_v57 = vsel %vm111_vm2, 4.0, %v109_v55 }
 0x158   :  { %v112_v58 = vsel %vm110_vm3, 4.0, %v108_v56  ;;  %v117_v59 = vsel %vm115_vm4, 6.0, %v113_v57 }
 0x159   :  { %v116_v60 = vsel %vm114_vm5, 6.0, %v112_v58  ;;  %v121_v61 = vsub.f32 0.0, %v117_v59 }
 0x15a   :  { %v120_v62 = vsub.f32 0.0, %v116_v60 }
 0x15b   :  { %v123_v63 = vsel %vm119_vm6, %v121_v61, %v117_v59 }
 0x15c   :  { %v122_v0 = vsel %vm118_vm7, %v120_v62, %v116_v60  ;;  %v125_v1 = vmul.f32 %v123_v63, %v245_v22 }
 0x15d   :  { %v124_v2 = vmul.f32 %v122_v0, %v247_v23 }
 0x15e   :  { %127 = vst [vmem:[#allocation6 + $0x8] sm:$0xff] %v125_v1 }
 0x15f   :  { %126 = vst [vmem:[#allocation6] sm:$0xff] %v124_v2 }
 0x160   :  { %140 = dma.vmem_to_hbm [thread:$0]  %s133_s20, 256, %s135_s23, [#allocation5], %s211_s14, %s211_s14, %s212_s15  }
 0x161   :  { %208 = dma.done.wait [#allocation5], 256  }
 0x162   :  { %209 = vsyncadd [#allocation5], 4294967040 }
 0x163   :  { %145 = vsyncpa [#allocation4], 1 }
 0x164   :  { %146 = vsyncpa [#allocation5], 1 }

</bundles_post_ra>
